<compile_context>
chip_gen: v5e
topology: v5e:2x2
jax: 0.10.0
libtpu: 0.0.40
codegen_flags: <defaults>
</compile_context>

<pallas_src>
import math

import jax
import jax.numpy as jnp
from jax import lax
from jax.experimental import pallas as pl
from jax.experimental.pallas import tpu as pltpu

ALPHA = 1e-05
TINY = 1.17549e-38
EPS = 1.19209e-07
LOG_DET_AFF = math.log1p(-ALPHA)


# ----------------------------------------------------------------------------
# Kernel bodies
# ----------------------------------------------------------------------------
def _segment_sum(terms, d, g):
    """Sum over groups of `d` consecutive lanes. terms: (tb, g*d) -> (tb, g)."""
    if g == 1:
        return jnp.sum(terms, axis=-1, keepdims=True)
    gd = g * d
    col = lax.broadcasted_iota(jnp.int32, (gd, g), 0)
    grp = lax.broadcasted_iota(jnp.int32, (gd, g), 1)
    sel = ((col >= grp * d) & (col < (grp + 1) * d)).astype(terms.dtype)
    # Block-diagonal ones matrix on the (otherwise idle) MXU; products are
    # exact (x*1.0). HIGHEST precision -> f32 accumulation, matches jnp.sum.
    return jnp.dot(terms, sel, precision=lax.Precision.HIGHEST,
                   preferred_element_type=jnp.float32)


def _make_fwd_kernel(d, g):
    # reverse=False branch of Sigmoid.forward
    def kernel(x_ref, y_ref, ld_ref):
        x = x_ref[...].astype(jnp.float32)
        z = x * (1.0 - ALPHA) + 0.5 * ALPHA
        z = jnp.clip(z, TINY, 1.0 - EPS)
        log_z = jnp.log(z)
        log_1mz = jnp.log1p(-z)
        y_ref[...] = (log_z - log_1mz).astype(y_ref.dtype)
        ld_ref[...] = LOG_DET_AFF * d - _segment_sum(log_z + log_1mz, d, g)
    return kernel


def _make_rev_kernel(d, g):
    # reverse=True branch of Sigmoid.forward
    def kernel(x_ref, y_ref, ld_ref):
        x = x_ref[...].astype(jnp.float32)
        # single exp per element feeds both softplus(-x) and sigmoid(x)
        e = jnp.exp(-jnp.abs(x))
        sp_neg_x = jnp.log1p(e) + jnp.maximum(-x, 0.0)      # softplus(-x), stable
        inv = pl.reciprocal(1.0 + e, approx=False)
        s = jnp.where(x >= 0.0, inv, e * inv)                # sigmoid(x)
        s = jnp.clip(s, TINY, 1.0 - EPS)
        y_ref[...] = ((s - 0.5 * ALPHA) / (1.0 - ALPHA)).astype(y_ref.dtype)
        ld_ref[...] = _segment_sum(-x - 2.0 * sp_neg_x, d, g) - LOG_DET_AFF * d
    return kernel


# ----------------------------------------------------------------------------
# Tiling / launch helpers
# ----------------------------------------------------------------------------
def _round_up8(n):
    return -(-n // 8) * 8


def _tpu_params():
    """(num_tensorcores, per-buffer tile byte target, scoped vmem limit)."""
    kind = ""
    try:
        kind = (jax.devices()[0].device_kind or "").lower()
    except Exception:
        pass
    two_tc = ("v7" in kind) or ("v4" in kind) or ("v5p" in kind)
    num_tc = 2 if two_tc else 1
    if "v7" in kind:
        # v7x: 64 MiB physical VMEM per TC -> keep scoped limit at 32 MiB,
        # ~4 MiB tiles (x + y, double buffered ~= 16-17 MiB).
        target_bytes = 4 * 1024 * 1024
        vmem_limit = 32 * 1024 * 1024
    else:
        # v5e / v6e (128 MiB physical VMEM): bigger tiles, 64 MiB scoped limit.
        target_bytes = 8 * 1024 * 1024
        vmem_limit = 64 * 1024 * 1024
    return num_tc, target_bytes, vmem_limit


def _choose_tb(rows, cols, num_tc, target_bytes):
    """Row-tile size: large (multiple of 8) tiles, TC-count aware."""
    if rows <= 8:
        return int(rows)                      # single block == full row extent
    rows_r = _round_up8(rows)
    tb = max(8, (target_bytes // (cols * 4)) // 8 * 8)
    if num_tc > 1:
        # give each TensorCore >= 2 pipelined steps so DMA overlaps compute
        min_steps = 2 * num_tc
        if rows_r >= 8 * min_steps:
            tb = min(tb, max(8, (rows_r // min_steps) // 8 * 8))
    # single-TC (v5e/v6e): no halving -- it only adds per-step overhead
    return int(min(tb, rows_r))


def _run(kernel, x_in, ld_cols, tb, io_dtype, vmem_limit):
    bg, gd = x_in.shape
    grid = (pl.cdiv(bg, tb),)
    return pl.pallas_call(
        kernel,
        out_shape=(
            jax.ShapeDtypeStruct((bg, gd), io_dtype),
            jax.ShapeDtypeStruct((bg, ld_cols), jnp.float32),
        ),
        grid=grid,
        in_specs=[pl.BlockSpec((tb, gd), lambda i: (i, 0))],
        out_specs=(
            pl.BlockSpec((tb, gd), lambda i: (i, 0)),
            pl.BlockSpec((tb, ld_cols), lambda i: (i, 0)),
        ),
        compiler_params=pltpu.CompilerParams(
            dimension_semantics=("parallel",),
            vmem_limit_bytes=vmem_limit,
        ),
    )(x_in)


# ----------------------------------------------------------------------------
# Public wrapper
# ----------------------------------------------------------------------------
def sigmoid_forward(x, reverse=False, preserve_dtype=False):
    """Pallas equivalent of Sigmoid.forward(x, reverse). Returns (x_out, log_det_J).

    preserve_dtype=True keeps the caller's floating dtype for x/y I/O (compute
    stays f32 in-kernel, log_det_J stays f32) -- halves HBM traffic for bf16.
    """
    x = jnp.asarray(x)
    if preserve_dtype and jnp.issubdtype(x.dtype, jnp.floating):
        io_dtype = x.dtype
    else:
        io_dtype = jnp.float32
        x = x.astype(jnp.float32)

    batch_shape = x.shape[:-1]
    d = x.shape[-1]
    x2d = x.reshape((-1, d))
    b = x2d.shape[0]

    if b == 0 or d == 0:
        return (jnp.zeros(batch_shape + (d,), io_dtype),
                jnp.zeros(batch_shape, jnp.float32))

    num_tc, target_bytes, vmem_limit = _tpu_params()

    # Generalized lane fold: smallest g such that g*d is a multiple of 128,
    # so elementwise work and HBM stores run lane-dense.
    g = 1
    if d % 128 != 0:
        g = 128 // math.gcd(d, 128)
        if 8 * g * d * 4 > target_bytes:
            # folded 8-row tile would blow the per-buffer budget
            g = 1
            # TODO(synk): add a feature-axis ("arbitrary") grid dim with a
            # pl.when-accumulated logdet for extremely large D.

    make_kernel = _make_rev_kernel if reverse else _make_fwd_kernel

    b_main = (b // g) * g
    b_tail = b - b_main

    ys, lds = [], []
    if b_main > 0:
        x_main = x2d if b_tail == 0 else x2d[:b_main]
        x_main = x_main.reshape((b_main // g, g * d))   # contiguous, free reshape
        tb = _choose_tb(b_main // g, g * d, num_tc, target_bytes)
        y_m, ld_m = _run(make_kernel(d, g), x_main, g, tb, io_dtype, vmem_limit)
        ys.append(y_m.reshape((b_main, d)))
        lds.append(ld_m.reshape((b_main,)))
    if b_tail > 0:
        # tiny (< g rows) remainder: lane-sparse g=1 call, negligible traffic
        x_tail = x2d[b_main:]
        tb = _choose_tb(b_tail, d, num_tc, target_bytes)
        y_t, ld_t = _run(make_kernel(d, 1), x_tail, 1, tb, io_dtype, vmem_limit)
        ys.append(y_t)
        lds.append(ld_t.reshape((b_tail,)))

    y = ys[0] if len(ys) == 1 else jnp.concatenate(ys, axis=0)
    ld = lds[0] if len(lds) == 1 else jnp.concatenate(lds, axis=0)
    return y.reshape(batch_shape + (d,)), ld.reshape(batch_shape)


# ----------------------------------------------------------------------------
# Pure-JAX reference (mirror of the PyTorch module) + self-test
# ----------------------------------------------------------------------------
def _reference(x, reverse=False):
    x = jnp.asarray(x, jnp.float32)
    d = x.shape[-1]
    if reverse:
        ld = jnp.sum(-x - 2.0 * jax.nn.softplus(-x), axis=-1)
        z = jnp.clip(jax.nn.sigmoid(x), TINY, 1.0 - EPS)
        ld = ld - LOG_DET_AFF * d
        z = (z - 0.5 * ALPHA) / (1.0 - ALPHA)
    else:
        z = x * (1.0 - ALPHA) + 0.5 * ALPHA
        ld = LOG_DET_AFF * d
        z = jnp.clip(z, TINY, 1.0 - EPS)
        ld = ld - jnp.sum(jnp.log(z) + jnp.log1p(-z), axis=-1)
        z = jnp.log(z) - jnp.log1p(-z)
    return z, ld


if __name__ == "__main__":
    key = jax.random.PRNGKey(0)
    k1, k2, k3, k4, k5 = jax.random.split(key, 5)

    # 1) forward (reverse=False): values in (0,1); d=32 -> gcd fold g=4.
    x_fwd = jax.random.uniform(k1, (2, 4, 32), jnp.float32, minval=0.05, maxval=0.95)
    y_fwd, ld_fwd = sigmoid_forward(x_fwd, reverse=False)

    # 2) reverse: unconstrained reals, folded path.
    x_rev = jax.random.normal(k2, (8, 32), jnp.float32)
    y_rev, ld_rev = sigmoid_forward(x_rev, reverse=True)

    # 3) d=48 -> g=8 but b=5 < g: tiny-batch tail-only (g=1) path.
    x_odd = jax.random.uniform(k3, (5, 48), jnp.float32, minval=0.05, maxval=0.95)
    x_odd_rev = x_odd * 4.0 - 2.0
    y_of, ld_of = sigmoid_forward(x_odd, reverse=False)
    y_or, ld_or = sigmoid_forward(x_odd_rev, reverse=True)

    # 4) ragged batch split: d=32 -> g=4, b=9 -> 8-row folded main + 1-row tail.
    x_spl = jax.random.normal(k4, (9, 32), jnp.float32)
    y_sp, ld_sp = sigmoid_forward(x_spl, reverse=True)

    # 5) opt-in bf16 I/O path (d=64 -> g=2 fold).
    x_bf = jax.random.uniform(k5, (4, 2, 64), jnp.float32,
                              minval=0.05, maxval=0.95).astype(jnp.bfloat16)
    y_bf, ld_bf = sigmoid_forward(x_bf, reverse=False, preserve_dtype=True)

    jax.block_until_ready((y_fwd, ld_fwd, y_rev, ld_rev, y_of, ld_of,
                           y_or, ld_or, y_sp, ld_sp, y_bf, ld_bf))

    # correctness vs pure-JAX reference
    checks = [
        ((y_fwd, ld_fwd), _reference(x_fwd, reverse=False)),
        ((y_rev, ld_rev), _reference(x_rev, reverse=True)),
        ((y_of, ld_of), _reference(x_odd, reverse=False)),
        ((y_or, ld_or), _reference(x_odd_rev, reverse=True)),
        ((y_sp, ld_sp), _reference(x_spl, reverse=True)),
    ]
    for (y, ld), (y_ref, ld_ref) in checks:
        assert jnp.allclose(y, y_ref, rtol=1e-5, atol=1e-5), "y mismatch"
        assert jnp.allclose(ld, ld_ref, rtol=1e-5, atol=1e-4), "logdet mismatch"

    # bf16 I/O path: y rounded to bf16 (loose tol), ld still f32 (tight tol)
    y_bf_ref, ld_bf_ref = _reference(x_bf, reverse=False)
    assert jnp.allclose(y_bf.astype(jnp.float32), y_bf_ref, rtol=2e-2, atol=2e-2), "bf16 y mismatch"
    assert jnp.allclose(ld_bf, ld_bf_ref, rtol=1e-5, atol=1e-3), "bf16 logdet mismatch"

    print("KERNEL_OK")
</pallas_src>

<mosaic_0001>
module attributes {stable_mosaic.version = 11 : i64} {
  func.func @kernel(%arg0: i32, %arg1: memref<2x128xf32, #tpu.memory_space<vmem>>, %arg2: memref<2x128xf32, #tpu.memory_space<vmem>>, %arg3: memref<2x4xf32, #tpu.memory_space<vmem>>) attributes {dimension_semantics = [#tpu.dimension_semantics<parallel>], iteration_bounds = array<i64: 1>, scalar_prefetch = 0 : i64, scratch_operands = 0 : i64, tpu.core_type = #tpu.core_type<tc>, window_params = [{transform_indices = @transform_0, window_bounds = array<i64: 2, 128>}, {transform_indices = @transform_1, window_bounds = array<i64: 2, 128>}, {transform_indices = @transform_2, window_bounds = array<i64: 2, 4>}]} {
    %c0 = arith.constant 0 : index
    %c0_0 = arith.constant 0 : index
    %0 = vector.load %arg1[%c0, %c0_0] : memref<2x128xf32, #tpu.memory_space<vmem>>, vector<2x128xf32>
    %cst = arith.constant 0.999989986 : f32
    %1 = vector.broadcast %cst : f32 to vector<2x128xf32>
    %2 = arith.mulf %0, %1 : vector<2x128xf32>
    %cst_1 = arith.constant 5.000000e-06 : f32
    %3 = vector.broadcast %cst_1 : f32 to vector<2x128xf32>
    %4 = arith.addf %2, %3 : vector<2x128xf32>
    %cst_2 = arith.constant 1.175490e-38 : f32
    %cst_3 = arith.constant 0.99999988 : f32
    %5 = vector.broadcast %cst_2 : f32 to vector<2x128xf32>
    %6 = arith.maximumf %5, %4 : vector<2x128xf32>
    %7 = vector.broadcast %cst_3 : f32 to vector<2x128xf32>
    %8 = arith.minimumf %7, %6 : vector<2x128xf32>
    %9 = math.log %8 : vector<2x128xf32>
    %cst_4 = arith.constant 0.000000e+00 : f32
    %10 = vector.broadcast %cst_4 : f32 to vector<2x128xf32>
    %11 = arith.subf %10, %8 : vector<2x128xf32>
    %12 = math.log1p %11 : vector<2x128xf32>
    %13 = arith.subf %9, %12 : vector<2x128xf32>
    %c0_5 = arith.constant 0 : index
    %c0_6 = arith.constant 0 : index
    %14 = vector.load %arg2[%c0_5, %c0_6] : memref<2x128xf32, #tpu.memory_space<vmem>>, vector<2x128xf32>
    tpu.vector_store %arg2[%c0_5, %c0_6], %13 {strides = array<i32>} : memref<2x128xf32, #tpu.memory_space<vmem>>, vector<2x128xf32>,
    %15 = arith.addf %9, %12 : vector<2x128xf32>
    %16 = tpu.iota {dimensions = array<i32: 0>} : vector<128x4xi32>
    %17 = tpu.iota {dimensions = array<i32: 1>} : vector<128x4xi32>
    %c32_i32 = arith.constant 32 : i32
    %18 = vector.broadcast %c32_i32 : i32 to vector<128x4xi32>
    %19 = arith.muli %17, %18 : vector<128x4xi32>
    %20 = arith.cmpi sge, %16, %19 : vector<128x4xi32>
    %c1_i32 = arith.constant 1 : i32
    %21 = vector.broadcast %c1_i32 : i32 to vector<128x4xi32>
    %22 = arith.addi %17, %21 : vector<128x4xi32>
    %c32_i32_7 = arith.constant 32 : i32
    %23 = vector.broadcast %c32_i32_7 : i32 to vector<128x4xi32>
    %24 = arith.muli %22, %23 : vector<128x4xi32>
    %25 = arith.cmpi slt, %16, %24 : vector<128x4xi32>
    %26 = arith.andi %20, %25 : vector<128x4xi1>
    %27 = arith.extui %26 : vector<128x4xi1> to vector<128x4xi32>
    %28 = arith.sitofp %27 : vector<128x4xi32> to vector<128x4xf32>
    %cst_8 = arith.constant dense<0.000000e+00> : vector<2x4xf32>
    %29 = tpu.matmul %15, %28, %cst_8 {dimension_numbers = #tpu.dot_dimension_numbers<[1], [0], [0], [1], [0, 0, 1, 1], [], []>, precision = #tpu.contract_precision<fp32>} : vector<2x128xf32>, vector<128x4xf32>, vector<2x4xf32> -> vector<2x4xf32>
    %cst_9 = arith.constant -3.20001593E-4 : f32
    %30 = vector.broadcast %cst_9 : f32 to vector<2x4xf32>
    %31 = arith.subf %30, %29 : vector<2x4xf32>
    %c0_10 = arith.constant 0 : index
    %c0_11 = arith.constant 0 : index
    %32 = vector.load %arg3[%c0_10, %c0_11] : memref<2x4xf32, #tpu.memory_space<vmem>>, vector<2x4xf32>
    tpu.vector_store %arg3[%c0_10, %c0_11], %31 {strides = array<i32>} : memref<2x4xf32, #tpu.memory_space<vmem>>, vector<2x4xf32>,
    return
  }
  func.func @transform_0(%arg0: i32) -> (i32, i32) {
    %c0_i32 = arith.constant 0 : i32
    %c0_i32_0 = arith.constant 0 : i32
    return %arg0, %c0_i32 : i32, i32
  }
  func.func @transform_1(%arg0: i32) -> (i32, i32) {
    %c0_i32 = arith.constant 0 : i32
    %c0_i32_0 = arith.constant 0 : i32
    return %arg0, %c0_i32 : i32, i32
  }
  func.func @transform_2(%arg0: i32) -> (i32, i32) {
    %c0_i32 = arith.constant 0 : i32
    %c0_i32_0 = arith.constant 0 : i32
    return %arg0, %c0_i32 : i32, i32
  }
}

</mosaic_0001>

<bundles_post_ra>
// kernel: tpu_custom_call.1
= control target key start
LH: loop header
LB: loop body
LE: loop exit
PB: predicated region body
PF: predicated region fallthrough
CT: control target
= control target key end

     0   :  { %8 = vsyncpa [#allocation3], 0  ;;  %s1201_s0 = inlined_call_operand.hbm [shape: f32[2,128], index: 0, kind: input, shape index: {}]   ;;  %s1202_s1 = inlined_call_operand.hbm [shape: f32[2,128], index: 1, kind: output, shape index: {0}]   ;;  %s1203_s2 = inlined_call_operand.hbm [shape: f32[2,4], index: 2, kind: output, shape index: {1}]  }
   0x1   :  { %9 = vsyncpa [#allocation4], 0 }
   0x2   :  { %10 = vsyncpa [#allocation7], 0  ;;  %s16_s11 = sshll.u32 %s1201_s0, 4  ;;  %s676_s12 = smov [#allocation2]   ;;  %v46_v0 = vlaneseq  ;;  %s17_s11 = int_to_ptr.hbm [resolvable:$true] %s16_s11 }
   0x3   :  { %s18_s13 = sshll.u32 %s676_s12, 4  ;;  %s19_s13 = int_to_ptr.vmem [resolvable:$true] %s18_s13 }
   0x4   :  { %21 = dma.hbm_to_vmem [thread:$0]  %s17_s11, 32, %s19_s13, [#allocation3]  }
   0x5   :  { %670 = dma.done.wait [#allocation3], 32  }
   0x6   :  { %671 = vsyncadd [#allocation3], 4294967264  ;;  %v699_v1 = vshrl.u32 %v46_v0, 7  ;;  %v64_v2 = vand.u32 127, %v46_v0  ;;  %v677_v14 = vmov 1.0   ;;  %v678_v16 = vmov 0.0  }
   0x7   :  { %v1220_v49 = vmov 0  ;;  %v1222_v56 = vmov 0  ;;  %s679_s0 = smov [#allocation5]   ;;  %s499_s17 = sshll.u32 %s1202_s1, 4  ;;  %s500_s17 = int_to_ptr.hbm [resolvable:$true] %s499_s17 }
   0x8   :  { %v62_v3 = vadd.s32 120, %v699_v1  ;;  %v702_v4 = vmul.u32 32, %v64_v2  ;;  %v82_v5 = vadd.s32 1, %v64_v2  ;;  %v61_v6 = vadd.s32 112, %v699_v1  ;;  %s497_s14 = sshll.u32 %s679_s0, 4  ;;  %s680_s18 = smov [#allocation6]   ;;  %s498_s14 = int_to_ptr.vmem [resolvable:$true] %s497_s14 }
   0x9   :  { %v60_v7 = vadd.s32 104, %v699_v1  ;;  %v59_v8 = vadd.s32 96, %v699_v1  ;;  %v58_v9 = vadd.s32 88, %v699_v1  ;;  %v57_v10 = vadd.s32 80, %v699_v1  ;;  %s508_s19 = sshll.u32 %s680_s18, 4  ;;  %s510_s1 = sshll.u32 %s1203_s2, 4  ;;  %s509_s19 = int_to_ptr.vmem [resolvable:$true] %s508_s19  ;;  %s511_s1 = int_to_ptr.hbm [resolvable:$true] %s510_s1 }
   0xa   :  { %vm81_vm0 = vcmp.ge.s32.totalorder %v62_v3, %v702_v4  ;;  %v710_v11 = vmul.u32 32, %v82_v5  ;;  %vm80_vm1 = vcmp.ge.s32.totalorder %v61_v6, %v702_v4  ;;  %v56_v12 = vadd.s32 72, %v699_v1 }
   0xb   :  { %vm79_vm2 = vcmp.ge.s32.totalorder %v60_v7, %v702_v4  ;;  %vm78_vm3 = vcmp.ge.s32.totalorder %v59_v8, %v702_v4  ;;  %vm77_vm4 = vcmp.ge.s32.totalorder %v58_v9, %v702_v4  ;;  %vm76_vm5 = vcmp.ge.s32.totalorder %v57_v10, %v702_v4 }
   0xc   :  { %vm99_vm6 = vcmp.lt.s32.totalorder %v62_v3, %v710_v11  ;;  %vm98_vm7 = vcmp.lt.s32.totalorder %v61_v6, %v710_v11  ;;  %vm97_vm8 = vcmp.lt.s32.totalorder %v60_v7, %v710_v11  ;;  %vm96_vm9 = vcmp.lt.s32.totalorder %v59_v8, %v710_v11 }
   0xd   :  { %vm722_vm10 = vmand %vm81_vm0, %vm99_vm6  ;;  %vm95_vm11 = vcmp.lt.s32.totalorder %v58_v9, %v710_v11  ;;  %vm94_vm12 = vcmp.lt.s32.totalorder %v57_v10, %v710_v11  ;;  %vm75_vm13 = vcmp.ge.s32.totalorder %v56_v12, %v702_v4  ;;  %vm93_vm14 = vcmp.lt.s32.totalorder %v56_v12, %v710_v11 }
   0xe   :  { %541 = vmatpush.msk.msra.mxu0 %vm722_vm10, %v677_v14  ;;  %vm735_vm15 = vmand %vm80_vm1, %vm98_vm7  ;;  %v540_v17 = vsel %vm722_vm10, 1.0, %v678_v16  ;;  %v55_v18 = vadd.s32 64, %v699_v1  ;;  %v54_v19 = vadd.s32 56, %v699_v1  ;;  %v53_v20 = vadd.s32 48, %v699_v1  ;;  %557 = vmatpush.msk.msra.mxu3 %vm722_vm10, %v677_v14 }
   0xf   :  { %vm752_vm0 = vmand %vm79_vm2, %vm97_vm8  ;;  %v756_v22 = vsub.f32 %v540_v17, %v540_v17  ;;  %v539_v23 = vsel %vm735_vm15, 1.0, %v678_v16  ;;  %v762_v24 = vadd.s32 40, %v699_v1  ;;  %v765_v25 = vadd.s32 32, %v699_v1 }
  0x10   :  { %542 = vmatpush.msk.msra.mxu0 %vm735_vm15, %v677_v14  ;;  %vm774_vm1 = vmand %vm78_vm3, %vm96_vm9  ;;  %v778_v27 = vsub.f32 %v539_v23, %v539_v23  ;;  %v538_v28 = vsel %vm752_vm0, 1.0, %v678_v16  ;;  %vm74_vm2 = vcmp.ge.s32.totalorder %v55_v18, %v702_v4  ;;  %vm92_vm6 = vcmp.lt.s32.totalorder %v55_v18, %v710_v11  ;;  %558 = vmatpush.msk.msra.mxu3 %vm735_vm15, %v677_v14 }
  0x11   :  { %v191_v29 = vand.u32 4294901760, %v756_v22  ;;  %vm793_vm3 = vmand %vm77_vm4, %vm95_vm11  ;;  %v797_v31 = vsub.f32 %v538_v28, %v538_v28  ;;  %v537_v32 = vsel %vm774_vm1, 1.0, %v678_v16  ;;  %vm73_vm7 = vcmp.ge.s32.totalorder %v54_v19, %v702_v4  ;;  %292 = vmatpush.msra.mxu2 %v756_v22 }
  0x12   :  { %543 = vmatpush.msk.msra.mxu0 %vm752_vm0, %v677_v14  ;;  %v197_v33 = vand.u32 4294901760, %v778_v27  ;;  %vm812_vm4 = vmand %vm76_vm5, %vm94_vm12  ;;  %v816_v35 = vsub.f32 %v537_v32, %v537_v32  ;;  %v536_v36 = vsel %vm793_vm3, 1.0, %v678_v16  ;;  %vm91_vm8 = vcmp.lt.s32.totalorder %v54_v19, %v710_v11  ;;  %559 = vmatpush.msk.msra.mxu3 %vm752_vm0, %v677_v14 }
  0x13   :  { %v192_v37 = vsub.f32 %v756_v22, %v191_v29  ;;  %v203_v38 = vand.u32 4294901760, %v797_v31  ;;  %vm833_vm5 = vmand %vm75_vm13, %vm93_vm14  ;;  %v837_v40 = vsub.f32 %v536_v36, %v536_v36  ;;  %v535_v41 = vsel %vm812_vm4, 1.0, %v678_v16  ;;  %295 = vmatpush.msra.mxu2 %v778_v27 }
  0x14   :  { %544 = vmatpush.msk.msra.mxu0 %vm774_vm1, %v677_v14  ;;  %v198_v42 = vsub.f32 %v778_v27, %v197_v33  ;;  %v209_v43 = vand.u32 4294901760, %v816_v35  ;;  %v850_v44 = vsub.f32 %v535_v41, %v535_v41  ;;  %v534_v45 = vsel %vm833_vm5, 1.0, %v678_v16  ;;  %560 = vmatpush.msk.msra.mxu3 %vm774_vm1, %v677_v14  ;;  %vm866_vm9 = vmand %vm74_vm2, %vm92_vm6 }
  0x15   :  { %v193_v46 = vand.u32 4294901760, %v192_v37  ;;  %v204_v47 = vsub.f32 %v797_v31, %v203_v38  ;;  %v215_v48 = vand.u32 4294901760, %v837_v40  ;;  %v1221_v49 = vsel %vm866_vm9, 4294967295, %v1220_v49  ;;  %298 = vmatpush.msra.mxu2 %v797_v31  ;;  %vm891_vm12 = vmand %vm73_vm7, %vm91_vm8 }
  0x16   :  { %v870_v50 = vsub.f32 %v534_v45, %v534_v45  ;;  %v199_v51 = vand.u32 4294901760, %v198_v42  ;;  %545 = vmatpush.msk.msra.mxu0 %vm793_vm3, %v677_v14  ;;  %v210_v52 = vsub.f32 %v816_v35, %v209_v43  ;;  %v221_v53 = vand.u32 4294901760, %v850_v44  ;;  %561 = vmatpush.msk.msra.mxu3 %vm793_vm3, %v677_v14 }
  0x17   :  { %vm72_vm11 = vcmp.ge.s32.totalorder %v53_v20, %v702_v4  ;;  %194 = vmatpush.msra.mxu1 %v193_v46  ;;  %v205_v54 = vand.u32 4294901760, %v204_v47  ;;  %v216_v55 = vsub.f32 %v837_v40, %v215_v48  ;;  %v1223_v56 = vsel %vm891_vm12, 4294967295, %v1222_v56  ;;  %301 = vmatpush.msra.mxu2 %v816_v35 }
  0x18   :  { %v227_v57 = vand.u32 4294901760, %v870_v50  ;;  %vm90_vm13 = vcmp.lt.s32.totalorder %v53_v20, %v710_v11  ;;  %546 = vmatpush.msk.msra.mxu0 %vm812_vm4, %v677_v14  ;;  %v222_v58 = vsub.f32 %v850_v44, %v221_v53  ;;  %v533_v60 = vsel %vm866_vm9, 1.0, %v678_v16  ;;  %562 = vmatpush.msk.msra.mxu3 %vm812_vm4, %v677_v14 }
  0x19   :  { %vm904_vm14 = vmand %vm72_vm11, %vm90_vm13  ;;  %vm71_vm2 = vcmp.ge.s32.totalorder %v762_v24, %v702_v4  ;;  %200 = vmatpush.msra.mxu1 %v199_v51  ;;  %v211_v61 = vand.u32 4294901760, %v210_v52  ;;  %v217_v62 = vand.u32 4294901760, %v216_v55  ;;  %v916_v63 = vsub.f32 %v533_v60, %v533_v60  ;;  %304 = vmatpush.msra.mxu2 %v837_v40 }
  0x1a   :  { %vm89_vm6 = vcmp.lt.s32.totalorder %v762_v24, %v710_v11  ;;  %547 = vmatpush.msk.msra.mxu0 %vm833_vm5, %v677_v14  ;;  %v228_v0 = vsub.f32 %v870_v50, %v227_v57  ;;  %v532_v3 = vsel %vm891_vm12, 1.0, %v678_v16  ;;  %vm70_vm8 = vcmp.ge.s32.totalorder %v765_v25, %v702_v4  ;;  %563 = vmatpush.msk.msra.mxu3 %vm833_vm5, %v677_v14 }
  0x1b   :  { %vm927_vm7 = vmand %vm71_vm2, %vm89_vm6  ;;  %vm88_vm11 = vcmp.lt.s32.totalorder %v765_v25, %v710_v11  ;;  %206 = vmatpush.msra.mxu1 %v205_v54  ;;  %v223_v5 = vand.u32 4294901760, %v222_v58  ;;  %v233_v6 = vand.u32 4294901760, %v916_v63  ;;  %v942_v7 = vsub.f32 %v532_v3, %v532_v3  ;;  %307 = vmatpush.msra.mxu2 %v850_v44  ;;  %v26_v54 = vld [vmem:[#allocation2] sm:$0x3] }
  0x1c   :  { %vm944_vm13 = vmand %vm70_vm8, %vm88_vm11  ;;  %v531_v9 = vsel %vm904_vm14, 1.0, %v678_v16  ;;  %548 = vmatpush.msk.msra.mxu0 %vm866_vm9, %v677_v14  ;;  %v50_v12 = vadd.s32 24, %v699_v1  ;;  %v530_v17 = vsel %vm927_vm7, 1.0, %v678_v16  ;;  %v49_v18 = vadd.s32 16, %v699_v1  ;;  %564 = vmatpush.msk.msra.mxu3 %vm866_vm9, %v677_v14 }
  0x1d   :  { %v955_v10 = vsub.f32 %v531_v9, %v531_v9  ;;  %212 = vmatpush.msra.mxu1 %v211_v61  ;;  %v234_v19 = vsub.f32 %v916_v63, %v233_v6  ;;  %v239_v20 = vand.u32 4294901760, %v942_v7  ;;  %v969_v23 = vsub.f32 %v530_v17, %v530_v17  ;;  %310 = vmatpush.msra.mxu2 %v870_v50 }
  0x1e   :  { %v529_v24 = vsel %vm944_vm13, 1.0, %v678_v16  ;;  %549 = vmatpush.msk.msra.mxu0 %vm891_vm12, %v677_v14  ;;  %vm69_vm2 = vcmp.ge.s32.totalorder %v50_v12, %v702_v4  ;;  %vm87_vm6 = vcmp.lt.s32.totalorder %v50_v12, %v710_v11  ;;  %vm68_vm8 = vcmp.ge.s32.totalorder %v49_v18, %v702_v4  ;;  %565 = vmatpush.msk.msra.mxu3 %vm891_vm12, %v677_v14 }
  0x1f   :  { %v245_v25 = vand.u32 4294901760, %v955_v10  ;;  %218 = vmatpush.msra.mxu1 %v217_v62  ;;  %v229_v28 = vand.u32 4294901760, %v228_v0  ;;  %v240_v32 = vsub.f32 %v942_v7, %v239_v20  ;;  %vm988_vm11 = vmand %vm69_vm2, %vm87_vm6  ;;  %v251_v37 = vand.u32 4294901760, %v969_v23  ;;  %313 = vmatpush.msra.mxu2 %v916_v63 }
  0x20   :  { %vm86_vm9 = vcmp.lt.s32.totalorder %v49_v18, %v710_v11  ;;  %550 = vmatpush.msk.msra.mxu0 %vm904_vm14, %v677_v14  ;;  %v1002_v42 = vsub.f32 %v529_v24, %v529_v24  ;;  %v48_v45 = vadd.s32 8, %v699_v1  ;;  %v528_v46 = vsel %vm988_vm11, 1.0, %v678_v16  ;;  %566 = vmatpush.msk.msra.mxu3 %vm904_vm14, %v677_v14 }
  0x21   :  { %vm998_vm12 = vmand %vm68_vm8, %vm86_vm9  ;;  %224 = vmatpush.msra.mxu1 %v223_v5  ;;  %v235_v47 = vand.u32 4294901760, %v234_v19  ;;  %v246_v51 = vsub.f32 %v955_v10, %v245_v25  ;;  %v1014_v52 = vsub.f32 %v528_v46, %v528_v46  ;;  %316 = vmatpush.msra.mxu2 %v942_v7  ;;  %v241_v55 = vand.u32 4294901760, %v240_v32 }
  0x22   :  { %551 = vmatpush.msk.msra.mxu0 %vm927_vm7, %v677_v14  ;;  %v257_v58 = vand.u32 4294901760, %v1002_v42  ;;  %vm67_vm2 = vcmp.ge.s32.totalorder %v48_v45, %v702_v4  ;;  %vm85_vm6 = vcmp.lt.s32.totalorder %v48_v45, %v710_v11  ;;  %567 = vmatpush.msk.msra.mxu3 %vm927_vm7, %v677_v14  ;;  %v252_v60 = vsub.f32 %v969_v23, %v251_v37 }
  0x23   :  { %230 = vmatpush.msra.mxu1 %v229_v28  ;;  %vm1031_vm8 = vmand %vm67_vm2, %vm85_vm6  ;;  %v263_v62 = vand.u32 4294901760, %v1014_v52  ;;  %vm84_vm9 = vcmp.lt.s32.totalorder %v699_v1, %v710_v11  ;;  %v527_v0 = vsel %vm998_vm12, 1.0, %v678_v16  ;;  %319 = vmatpush.msra.mxu2 %v955_v10  ;;  %vm1236_vm2 = vcmp.ge.s32.totalorder %v699_v1, %v702_v4 }
  0x24   :  { %552 = vmatpush.msk.msra.mxu0 %vm944_vm13, %v677_v14  ;;  %vm1048_vm6 = vmand %vm1236_vm2, %vm84_vm9  ;;  %v1052_v5 = vsub.f32 %v527_v0, %v527_v0  ;;  %v526_v11 = vsel %vm1031_vm8, 1.0, %v678_v16  ;;  %568 = vmatpush.msk.msra.mxu3 %vm944_vm13, %v677_v14  ;;  %v27_v9 = vmul.f32 0.99999, %v26_v54  ;;  %v247_v12 = vand.u32 4294901760, %v246_v51 }
  0x25   :  { %236 = vmatpush.msra.mxu1 %v235_v47  ;;  %v258_v1 = vsub.f32 %v1002_v42, %v257_v58  ;;  %v1063_v4 = vsub.f32 %v526_v11, %v526_v11  ;;  %v525_v17 = vsel %vm1048_vm6, 1.0, %v678_v16  ;;  %322 = vmatpush.msra.mxu2 %v969_v23  ;;  %v253_v28 = vand.u32 4294901760, %v252_v60 }
  0x26   :  { %553 = vmatpush.msk.msra.mxu0 %vm988_vm11, %v677_v14  ;;  %v269_v18 = vand.u32 4294901760, %v1052_v5  ;;  %v1073_v19 = vsub.f32 %v525_v17, %v525_v17  ;;  %569 = vmatpush.msk.msra.mxu3 %vm988_vm11, %v677_v14  ;;  %v28_v24 = vadd.f32 5e-06, %v27_v9  ;;  %v264_v16 = vsub.f32 %v1014_v52, %v263_v62 }
  0x27   :  { %242 = vmatpush.msra.mxu1 %v241_v55  ;;  %v275_v32 = vand.u32 4294901760, %v1063_v4  ;;  %325 = vmatpush.msra.mxu2 %v1002_v42  ;;  %v259_v46 = vand.u32 4294901760, %v258_v1 }
  0x28   :  { %554 = vmatpush.msk.msra.mxu0 %vm998_vm12, %v677_v14  ;;  %570 = vmatpush.msk.msra.mxu3 %vm998_vm12, %v677_v14  ;;  %v29_v45 = vmax.f32 %v28_v24, 1.17549e-38  ;;  %v270_v47 = vsub.f32 %v1052_v5, %v269_v18  ;;  %v281_v51 = vand.u32 4294901760, %v1073_v19  ;;  %v265_v55 = vand.u32 4294901760, %v264_v16 }
  0x29   :  { %248 = vmatpush.msra.mxu1 %v247_v12  ;;  %328 = vmatpush.msra.mxu2 %v1014_v52  ;;  %v276_v60 = vsub.f32 %v1063_v4, %v275_v32 }
  0x2a   :  { %555 = vmatpush.msk.msra.mxu0 %vm1031_vm8, %v677_v14  ;;  %571 = vmatpush.msk.msra.mxu3 %vm1031_vm8, %v677_v14  ;;  %v30_v54 = vmin.f32 %v29_v45, 0.9999999  ;;  %v271_v11 = vand.u32 4294901760, %v270_v47  ;;  %v282_v9 = vsub.f32 %v1073_v19, %v281_v51 }
  0x2b   :  { %254 = vmatpush.msra.mxu1 %v253_v28  ;;  %331 = vmatpush.msra.mxu2 %v1052_v5  ;;  %v277_v17 = vand.u32 4294901760, %v276_v60 }
  0x2c   :  { %556 = vmatpush.msk.msra.mxu0 %vm1048_vm6, %v677_v14  ;;  %v33_v0 = vsub.f32 0.0, %v30_v54  ;;  %572 = vmatpush.msk.msra.mxu3 %vm1048_vm6, %v677_v14  ;;  %594 = vlog2.f32 %v30_v54  ;;  %v283_v22 = vand.u32 4294901760, %v282_v9 }
  0x2d   :  { %260 = vmatpush.msra.mxu1 %v259_v46  ;;  %334 = vmatpush.msra.mxu2 %v1063_v4 }
  0x2e   :  { %386 = vmatpush.msrb.mxu0 %v191_v29  ;;  %v34_v12 = vadd.f32 1.0, %v33_v0  ;;  %v37_v1 = vmul.f32 -0.5, %v33_v0  ;;  %v40_v24 = vand.u32 2147483647, %v33_v0 }
  0x2f   :  { %266 = vmatpush.msra.mxu1 %v265_v55  ;;  %337 = vmatpush.msra.mxu2 %v1073_v19 }
  0x30   :  { %390 = vmatpush.msrb.mxu0 %v197_v33  ;;  %596 = vlog2.f32 %v34_v12  ;;  %v38_v29 = vadd.f32 1.0, %v37_v1  ;;  %vm41_vm9 = vcmp.lt.f32.partialorder %v40_v24, 0.0004427343 }
  0x31   :  { %272 = vmatpush.msra.mxu1 %v271_v11 }
  0x32   :  { %394 = vmatpush.msrb.mxu0 %v203_v38  ;;  %v595_v28 = vpop.eup %594  ;;  %v39_v27 = vmul.f32 %v38_v29, %v33_v0 }
  0x33   :  { %278 = vmatpush.msra.mxu1 %v277_v17  ;;  %v32_v16 = vmul.f32 0.6931472, %v595_v28 }
  0x34   :  { %398 = vmatpush.msrb.mxu0 %v209_v43 }
  0x35   :  { %284 = vmatpush.msra.mxu1 %v283_v22 }
  0x36   :  { %402 = vmatpush.msrb.mxu0 %v215_v48  ;;  %v597_v33 = vpop.eup %596 }
  0x37   :  { %573 = vmatpush.msk.msrb.mxu1 %vm722_vm10, %v677_v14  ;;  %v36_v31 = vmul.f32 0.6931472, %v597_v33  ;;  %vm1239_vm10 = vnez %v1221_v49 }
  0x38   :  { %406 = vmatpush.msrb.mxu0 %v221_v53 }
  0x39   :  { %574 = vmatpush.msk.msrb.mxu1 %vm735_vm15, %v677_v14  ;;  %v42_v35 = vsel %vm41_vm9, %v39_v27, %v36_v31  ;;  %vm1240_vm15 = vnez %v1223_v56 }
  0x3a   :  { %410 = vmatpush.msrb.mxu0 %v227_v57  ;;  %v45_v13 = vadd.f32 %v42_v35, %v32_v16  ;;  %v43_v34 = vsub.f32 %v32_v16, %v42_v35 }
  0x3b   :  { %575 = vmatpush.msk.msrb.mxu1 %vm752_vm0, %v677_v14  ;;  %vm490_vm0 = vcmask 25600  }
  0x3c   :  { %414 = vmatpush.msrb.mxu0 %v233_v6  ;;  %v180_v38 = vand.u32 4294901760, %v45_v13  ;;  %44 = vst [vmem:[#allocation5] sm:$0x3] %v43_v34 }
  0x3d   :  { %576 = vmatpush.msk.msrb.mxu1 %vm774_vm1, %v677_v14  ;;  %502 = dma.vmem_to_hbm [thread:$0]  %s498_s14, 32, %s500_s17, [#allocation4]  }
  0x3e   :  { %418 = vmatpush.msrb.mxu0 %v239_v20  ;;  %v181_v15 = vsub.f32 %v45_v13, %v180_v38  ;;  %286 = vmatmul.f32.vlgmr.msra.gmra.mxu1 %v180_v38 }
  0x3f   :  { %577 = vmatpush.msk.msrb.mxu1 %vm793_vm3, %v677_v14 }
  0x40   :  { %422 = vmatpush.msrb.mxu0 %v245_v25  ;;  %340 = vmatmul.f32.vlgmr.msra.gmra.mxu2 %v181_v15  ;;  %v182_v21 = vand.u32 4294901760, %v181_v15 }
  0x41   :  { %578 = vmatpush.msk.msrb.mxu1 %vm812_vm4, %v677_v14 }
  0x42   :  { %426 = vmatpush.msrb.mxu0 %v251_v37  ;;  %v183_v26 = vsub.f32 %v181_v15, %v182_v21  ;;  %379 = vmatmul.f32.vlgmr.msra.gmra.mxu3 %v182_v21 }
  0x43   :  { %579 = vmatpush.msk.msrb.mxu1 %vm833_vm5, %v677_v14 }
  0x44   :  { %430 = vmatpush.msrb.mxu0 %v257_v58  ;;  %v184_v30 = vand.u32 4294901760, %v183_v26 }
  0x45   :  { %580 = vmatpush.msk.msrb.mxu1 %vm1239_vm10, %v677_v14 }
  0x46   :  { %434 = vmatpush.msrb.mxu0 %v263_v62 }
  0x47   :  { %581 = vmatpush.msk.msrb.mxu1 %vm1240_vm15, %v677_v14  ;;  %185 = vmatmul.f32.vlgmr.msra.gmra.mxu0 %v184_v30 }
  0x48   :  { %438 = vmatpush.msrb.mxu0 %v269_v18 }
  0x49   :  { %582 = vmatpush.msk.msrb.mxu1 %vm904_vm14, %v677_v14 }
  0x4a   :  { %442 = vmatpush.msrb.mxu0 %v275_v32 }
  0x4b   :  { %583 = vmatpush.msk.msrb.mxu1 %vm927_vm7, %v677_v14 }
  0x4c   :  { %446 = vmatpush.msrb.mxu0 %v281_v51 }
  0x4d   :  { %584 = vmatpush.msk.msrb.mxu1 %vm944_vm13, %v677_v14 }
  0x4f   :  { %585 = vmatpush.msk.msrb.mxu1 %vm988_vm11, %v677_v14  ;;  %448 = vmatmul.f32.vlgmr.msrb.gmra.mxu0 %v180_v38 }
  0x51   :  { %586 = vmatpush.msk.msrb.mxu1 %vm998_vm12, %v677_v14 }
  0x53   :  { %587 = vmatpush.msk.msrb.mxu1 %vm1031_vm8, %v677_v14 }
  0x55   :  { %588 = vmatpush.msk.msrb.mxu1 %vm1048_vm6, %v677_v14 }
  0x56   :  { %485 = vmatmul.f32.vlgmr.msrb.gmra.mxu1 %v180_v38 }
  0xbb   :  { %v287_v39 = vpop.f32.mrf.mxu1 }
  0xc3   :  { %v341_v44 = vpop.f32.mrf.mxu2 }
  0xc4   :  { %v186_v40 = vpop.f32.mrf.mxu0 }
  0xc5   :  { %v288_v43 = vadd.f32 %v287_v39, %v186_v40  ;;  %v380_v49 = vpop.f32.mrf.mxu3 }
  0xc7   :  { %v342_v48 = vadd.f32 %v341_v44, %v288_v43 }
  0xc9   :  { %v381_v50 = vadd.f32 %v380_v49, %v342_v48 }
  0xcc   :  { %v449_v14 = vpop.f32.mrf.mxu0 }
  0xcd   :  { %v450_v53 = vadd.f32 %v449_v14, %v381_v50 }
  0xd3   :  { %v486_v56 = vpop.f32.mrf.mxu1 }
  0xd4   :  { %v487_v57 = vadd.f32 %v486_v56, %v450_v53 }
  0xd6   :  { %v489_v59 = vsub.f32 -0.0003200016, %v487_v57 }
  0xd8   :  { %491 = vst.msk [vmem:[#allocation6] sm:$0x3] %vm490_vm0, %v489_v59 }
  0xd9   :  { %513 = dma.vmem_to_hbm [thread:$0]  %s509_s19, 32, %s511_s1, [#allocation7]  }
  0xda   :  { %672 = dma.done.wait [#allocation4], 32  }
  0xdb   :  { %673 = vsyncadd [#allocation4], 4294967264 }
  0xdc   :  { %674 = dma.done.wait [#allocation7], 32  }
  0xdd   :  { %675 = vsyncadd [#allocation7], 4294967264 }
  0xde   :  { %522 = vsyncpa [#allocation3], 1 }
  0xdf   :  { %523 = vsyncpa [#allocation4], 1 }
  0xe0   :  { %524 = vsyncpa [#allocation7], 1 }

</bundles_post_ra>
